<compile_context>
chip_gen: v6e
topology: v6e:2x2x1
jax: 0.10.0
libtpu: 0.0.40
codegen_flags: <defaults>
</compile_context>

<pallas_src>
import math

import jax
import jax.numpy as jnp
from jax import lax
from jax.experimental import pallas as pl
from jax.experimental.pallas import tpu as pltpu


def _leaky(v):
    # leaky_relu(negative_slope=0.01); slope < 1 so max(v, 0.01*v) is exact.
    return jnp.maximum(v, 0.01 * v)


def _make_kernel(nlayers):
    def kernel(x_ref, *rest):
        out_ref = rest[-1]
        layer_refs = rest[:-1]

        # x block: (TILE, ci) -- exactly the HBM layout of x (pixels on rows),
        # so no wrapper transpose / pad pass is needed.
        xb = x_ref[...]

        h = xb
        for kl in range(nlayers):
            w = layer_refs[2 * kl][...]        # (C_out, C_in)
            b = layer_refs[2 * kl + 1][...]    # (C_out, 1)
            if kl == 0:
                # (C_out, C_in) x (TILE, C_in), contracting both last dims ->
                # (C_out, TILE): features land on sublanes, pixels on lanes,
                # so all following elementwise work and stores are lane-dense.
                h = lax.dot_general(
                    w, xb, (((1,), (1,)), ((), ())),
                    preferred_element_type=jnp.float32) + b
            else:
                h = jnp.dot(w, h, preferred_element_type=jnp.float32) + b
            if kl < nlayers - 1:
                h = _leaky(h)
            else:
                h = jnp.clip(h, -1.0, 1.0)
        out_ref[...] = h.astype(out_ref.dtype)

    return kernel


def _round_up(n, m):
    return ((n + m - 1) // m) * m


def pixel_pred_forward(x, params, *, tile=8192):
    """Pallas implementation of PixelPred.forward.

    x: (..., ci) float32.  params: list of (w, b) with w: (out, in), b: (out,)
    in torch nn.Linear layout.  Returns (..., co).
    """
    *lead, ci = x.shape
    N = 1
    for d in lead:
        N *= int(d)
    nlayers = len(params)
    co = params[-1][0].shape[0]

    # Free relayout: row-major reshape, no data movement.
    x2 = x.reshape(N, ci).astype(jnp.float32)

    # Tile is the lane width of the output block / sublane extent of the input
    # block: keep it a multiple of 128 and clamp to the problem size.
    tile = max(128, _round_up(min(int(tile), N), 128))
    n_tiles = pl.cdiv(N, tile)

    layer_args = []
    in_specs = [pl.BlockSpec((tile, ci), lambda i: (i, 0))]
    for (w, b) in params:
        cout, cin = w.shape
        layer_args.append(w.astype(jnp.float32))                   # (C_out, C_in)
        layer_args.append(b.reshape(cout, 1).astype(jnp.float32))  # (C_out, 1)
        # Constant index_maps: weights/biases stay resident across the grid.
        in_specs.append(pl.BlockSpec((cout, cin), lambda i: (0, 0)))
        in_specs.append(pl.BlockSpec((cout, 1), lambda i: (0, 0)))

    out = pl.pallas_call(
        _make_kernel(nlayers),
        grid=(n_tiles,),
        in_specs=in_specs,
        out_specs=pl.BlockSpec((co, tile), lambda i: (0, i)),
        out_shape=jax.ShapeDtypeStruct((co, N), jnp.float32),
        compiler_params=pltpu.CompilerParams(
            dimension_semantics=("parallel",),
            vmem_limit_bytes=32 * 1024 * 1024),
    )(x2, *layer_args)

    # The module API requires (..., co); this single small-output relayout is
    # the only wrapper-side pass left (16 B/pixel).
    return out.T.reshape(*lead, co)


# ---------------- reference (plain JAX, mirrors the torch module) -------------

def pixel_pred_reference(x, params):
    h = x
    n = len(params)
    for kl in range(n - 1):
        w, b = params[kl]
        h = _leaky(jnp.einsum("...i,oi->...o", h, w,
                              precision=jax.lax.Precision.HIGHEST) + b)
    w, b = params[-1]
    y = jnp.einsum("...i,oi->...o", h, w,
                   precision=jax.lax.Precision.HIGHEST) + b
    return jnp.clip(y, -1.0, 1.0)


# ---------------- deterministic parameter init (torch-default-like) -----------

def init_params(key, nlayers, ci, nch, co):
    dims = [ci] + [nch] * (nlayers - 1) + [co]
    params = []
    keys = jax.random.split(key, nlayers)
    for kl in range(nlayers):
        fan_in = dims[kl]
        bound = 1.0 / math.sqrt(fan_in)
        k1, k2 = jax.random.split(keys[kl])
        w = jax.random.uniform(k1, (dims[kl + 1], dims[kl]), jnp.float32,
                               -bound, bound)
        b = jax.random.uniform(k2, (dims[kl + 1],), jnp.float32, -bound, bound)
        params.append((w, b))
    return params


if __name__ == "__main__":
    # PixelPred(nlayers=3, ci=8, nch=32, co=4) applied per pixel of a
    # (B, H, W, ci) feature map: B=2, H=16, W=16 -> 512 pixels (one tile after
    # clamping the default 8192 tile to the problem size).
    nlayers, ci, nch, co = 3, 8, 32, 4
    B, H, W = 2, 16, 16

    key = jax.random.PRNGKey(0)
    kx, kp = jax.random.split(key)
    x = jax.random.normal(kx, (B, H, W, ci), jnp.float32)
    params = init_params(kp, nlayers, ci, nch, co)

    out = jax.block_until_ready(pixel_pred_forward(x, params))
    assert out.shape == (B, H, W, co)

    ref = jax.block_until_ready(pixel_pred_reference(x, params))
    # Kernel uses Mosaic's f32 MXU matmul (full-precision passes); 2e-3 leaves
    # a wide margin vs. the Precision.HIGHEST reference.
    err = float(jnp.max(jnp.abs(out - ref)))
    if err > 2e-3:
        raise AssertionError(f"mismatch vs reference: max abs err = {err}")

    print("KERNEL_OK")
</pallas_src>

<mosaic_0001>
module attributes {stable_mosaic.version = 11 : i64} {
  func.func @kernel(%arg0: i32, %arg1: memref<512x8xf32, #tpu.memory_space<vmem>>, %arg2: memref<32x8xf32, #tpu.memory_space<vmem>>, %arg3: memref<32x1xf32, #tpu.memory_space<vmem>>, %arg4: memref<32x32xf32, #tpu.memory_space<vmem>>, %arg5: memref<32x1xf32, #tpu.memory_space<vmem>>, %arg6: memref<4x32xf32, #tpu.memory_space<vmem>>, %arg7: memref<4x1xf32, #tpu.memory_space<vmem>>, %arg8: memref<4x512xf32, #tpu.memory_space<vmem>>) attributes {dimension_semantics = [#tpu.dimension_semantics<parallel>], iteration_bounds = array<i64: 1>, scalar_prefetch = 0 : i64, scratch_operands = 0 : i64, tpu.core_type = #tpu.core_type<tc>, window_params = [{transform_indices = @transform_0, window_bounds = array<i64: 512, 8>}, {pipeline_mode = #tpu.pipeline_mode<synchronous>, transform_indices = @transform_1, window_bounds = array<i64: 32, 8>}, {pipeline_mode = #tpu.pipeline_mode<synchronous>, transform_indices = @transform_2, window_bounds = array<i64: 32, 1>}, {pipeline_mode = #tpu.pipeline_mode<synchronous>, transform_indices = @transform_3, window_bounds = array<i64: 32, 32>}, {pipeline_mode = #tpu.pipeline_mode<synchronous>, transform_indices = @transform_4, window_bounds = array<i64: 32, 1>}, {pipeline_mode = #tpu.pipeline_mode<synchronous>, transform_indices = @transform_5, window_bounds = array<i64: 4, 32>}, {pipeline_mode = #tpu.pipeline_mode<synchronous>, transform_indices = @transform_6, window_bounds = array<i64: 4, 1>}, {transform_indices = @transform_7, window_bounds = array<i64: 4, 512>}]} {
    %c0 = arith.constant 0 : index
    %c0_0 = arith.constant 0 : index
    %0 = vector.load %arg1[%c0, %c0_0] : memref<512x8xf32, #tpu.memory_space<vmem>>, vector<512x8xf32>
    %c0_1 = arith.constant 0 : index
    %c0_2 = arith.constant 0 : index
    %1 = vector.load %arg2[%c0_1, %c0_2] : memref<32x8xf32, #tpu.memory_space<vmem>>, vector<32x8xf32>
    %c0_3 = arith.constant 0 : index
    %c0_4 = arith.constant 0 : index
    %2 = vector.load %arg3[%c0_3, %c0_4] : memref<32x1xf32, #tpu.memory_space<vmem>>, vector<32x1xf32>
    %cst = arith.constant dense<0.000000e+00> : vector<32x512xf32>
    %3 = tpu.matmul %1, %0, %cst {dimension_numbers = #tpu.dot_dimension_numbers<[1], [1], [0], [0], [0, 0, 1, 0], [], []>} : vector<32x8xf32>, vector<512x8xf32>, vector<32x512xf32> -> vector<32x512xf32>
    %4 = vector.broadcast %2 : vector<32x1xf32> to vector<32x512xf32>
    %5 = arith.addf %3, %4 : vector<32x512xf32>
    %cst_5 = arith.constant 0.00999999977 : f32
    %6 = vector.broadcast %cst_5 : f32 to vector<32x512xf32>
    %7 = arith.mulf %6, %5 : vector<32x512xf32>
    %8 = arith.maximumf %5, %7 : vector<32x512xf32>
    %c0_6 = arith.constant 0 : index
    %c0_7 = arith.constant 0 : index
    %9 = vector.load %arg4[%c0_6, %c0_7] : memref<32x32xf32, #tpu.memory_space<vmem>>, vector<32x32xf32>
    %c0_8 = arith.constant 0 : index
    %c0_9 = arith.constant 0 : index
    %10 = vector.load %arg5[%c0_8, %c0_9] : memref<32x1xf32, #tpu.memory_space<vmem>>, vector<32x1xf32>
    %cst_10 = arith.constant dense<0.000000e+00> : vector<32x512xf32>
    %11 = tpu.matmul %9, %8, %cst_10 {dimension_numbers = #tpu.dot_dimension_numbers<[1], [0], [0], [1], [0, 0, 1, 1], [], []>} : vector<32x32xf32>, vector<32x512xf32>, vector<32x512xf32> -> vector<32x512xf32>
    %12 = vector.broadcast %10 : vector<32x1xf32> to vector<32x512xf32>
    %13 = arith.addf %11, %12 : vector<32x512xf32>
    %cst_11 = arith.constant 0.00999999977 : f32
    %14 = vector.broadcast %cst_11 : f32 to vector<32x512xf32>
    %15 = arith.mulf %14, %13 : vector<32x512xf32>
    %16 = arith.maximumf %13, %15 : vector<32x512xf32>
    %c0_12 = arith.constant 0 : index
    %c0_13 = arith.constant 0 : index
    %17 = vector.load %arg6[%c0_12, %c0_13] : memref<4x32xf32, #tpu.memory_space<vmem>>, vector<4x32xf32>
    %c0_14 = arith.constant 0 : index
    %c0_15 = arith.constant 0 : index
    %18 = vector.load %arg7[%c0_14, %c0_15] : memref<4x1xf32, #tpu.memory_space<vmem>>, vector<4x1xf32>
    %cst_16 = arith.constant dense<0.000000e+00> : vector<4x512xf32>
    %19 = tpu.matmul %17, %16, %cst_16 {dimension_numbers = #tpu.dot_dimension_numbers<[1], [0], [0], [1], [0, 0, 1, 1], [], []>} : vector<4x32xf32>, vector<32x512xf32>, vector<4x512xf32> -> vector<4x512xf32>
    %20 = vector.broadcast %18 : vector<4x1xf32> to vector<4x512xf32>
    %21 = arith.addf %19, %20 : vector<4x512xf32>
    %cst_17 = arith.constant -1.000000e+00 : f32
    %cst_18 = arith.constant 1.000000e+00 : f32
    %22 = vector.broadcast %cst_17 : f32 to vector<4x512xf32>
    %23 = arith.maximumf %22, %21 : vector<4x512xf32>
    %24 = vector.broadcast %cst_18 : f32 to vector<4x512xf32>
    %25 = arith.minimumf %24, %23 : vector<4x512xf32>
    %c0_19 = arith.constant 0 : index
    %c0_20 = arith.constant 0 : index
    %26 = vector.load %arg8[%c0_19, %c0_20] : memref<4x512xf32, #tpu.memory_space<vmem>>, vector<4x512xf32>
    tpu.vector_store %arg8[%c0_19, %c0_20], %25 {strides = array<i32>} : memref<4x512xf32, #tpu.memory_space<vmem>>, vector<4x512xf32>,
    return
  }
  func.func @transform_0(%arg0: i32) -> (i32, i32) {
    %c0_i32 = arith.constant 0 : i32
    %c0_i32_0 = arith.constant 0 : i32
    return %arg0, %c0_i32 : i32, i32
  }
  func.func @transform_1(%arg0: i32) -> (i32, i32) {
    %c0_i32 = arith.constant 0 : i32
    %c0_i32_0 = arith.constant 0 : i32
    %c0_i32_1 = arith.constant 0 : i32
    return %c0_i32, %c0_i32_0 : i32, i32
  }
  func.func @transform_2(%arg0: i32) -> (i32, i32) {
    %c0_i32 = arith.constant 0 : i32
    %c0_i32_0 = arith.constant 0 : i32
    %c0_i32_1 = arith.constant 0 : i32
    return %c0_i32, %c0_i32_0 : i32, i32
  }
  func.func @transform_3(%arg0: i32) -> (i32, i32) {
    %c0_i32 = arith.constant 0 : i32
    %c0_i32_0 = arith.constant 0 : i32
    %c0_i32_1 = arith.constant 0 : i32
    return %c0_i32, %c0_i32_0 : i32, i32
  }
  func.func @transform_4(%arg0: i32) -> (i32, i32) {
    %c0_i32 = arith.constant 0 : i32
    %c0_i32_0 = arith.constant 0 : i32
    %c0_i32_1 = arith.constant 0 : i32
    return %c0_i32, %c0_i32_0 : i32, i32
  }
  func.func @transform_5(%arg0: i32) -> (i32, i32) {
    %c0_i32 = arith.constant 0 : i32
    %c0_i32_0 = arith.constant 0 : i32
    %c0_i32_1 = arith.constant 0 : i32
    return %c0_i32, %c0_i32_0 : i32, i32
  }
  func.func @transform_6(%arg0: i32) -> (i32, i32) {
    %c0_i32 = arith.constant 0 : i32
    %c0_i32_0 = arith.constant 0 : i32
    %c0_i32_1 = arith.constant 0 : i32
    return %c0_i32, %c0_i32_0 : i32, i32
  }
  func.func @transform_7(%arg0: i32) -> (i32, i32) {
    %c0_i32 = arith.constant 0 : i32
    %c0_i32_0 = arith.constant 0 : i32
    return %c0_i32, %arg0 : i32, i32
  }
}

</mosaic_0001>

<bundles_post_ra>
// kernel: tpu_custom_call.1
= control target key start
LH: loop header
LB: loop body
LE: loop exit
PB: predicated region body
PF: predicated region fallthrough
CT: control target
= control target key end

     0   :  { %vm119_vm0 = vcmask 64512   ;;  %v1162_v10 = vmov 0   ;;  %s1560_s0 = inlined_call_operand.vmem [shape: f32[512,8], index: 0, kind: input, shape index: {}]   ;;  %s1561_s1 = inlined_call_operand.vmem [shape: f32[32,8], index: 1, kind: input, shape index: {}]   ;;  %s1562_s2 = inlined_call_operand.vmem [shape: f32[32,1], index: 2, kind: input, shape index: {}]   ;;  %s1563_s3 = inlined_call_operand.vmem [shape: f32[32,32], index: 3, kind: input, shape index: {}]   ;;  %s1564_s4 = inlined_call_operand.vmem [shape: f32[32,1], index: 4, kind: input, shape index: {}]   ;;  %s1565_s5 = inlined_call_operand.vmem [shape: f32[4,32], index: 5, kind: input, shape index: {}]   ;;  %s1566_s6 = inlined_call_operand.vmem [shape: f32[4,1], index: 6, kind: input, shape index: {}]   ;;  %s1567_s7 = inlined_call_operand.hbm [shape: f32[4,512], index: 7, kind: output, shape index: {}]  }
   0x1   :  { %v58_v0 = vld [vmem:[%s1560_s0 + $0xf8] sm:$0xff]  ;;  %v57_v4 = vld [vmem:[%s1560_s0 + $0xf0] sm:$0xff]  ;;  %v56_v8 = vld [vmem:[%s1560_s0 + $0xe8] sm:$0xff]  ;;  %1139 = vset.pattern.permute.xlu1 %v1162_v10  ;;  %1138 = vset.pattern.permute.xlu0 %v1162_v10 }
   0x2   :  { %v90_v1 = vld [vmem:[%s1560_s0 + $0x1f8] sm:$0xff]  ;;  %1055 = vmatprep.subr.msk.mxu0 %vm119_vm0, %v58_v0  ;;  %v89_v5 = vld [vmem:[%s1560_s0 + $0x1f0] sm:$0xff]  ;;  %v88_v9 = vld [vmem:[%s1560_s0 + $0x1e8] sm:$0xff] }
   0x3   :  { %v42_v2 = vld [vmem:[%s1560_s0 + $0x78] sm:$0xff]  ;;  %1095 = vmatprep.subr.msk.mxu1 %vm119_vm0, %v90_v1  ;;  %v41_v6 = vld [vmem:[%s1560_s0 + $0x70] sm:$0xff]  ;;  %v40_v11 = vld [vmem:[%s1560_s0 + $0x68] sm:$0xff] }
   0x4   :  { %v74_v3 = vld [vmem:[%s1560_s0 + $0x178] sm:$0xff]  ;;  %1056 = vmatpush3.xpose.msk.msra.mxu0 %vm119_vm0, %v42_v2  ;;  %v73_v7 = vld [vmem:[%s1560_s0 + $0x170] sm:$0xff]  ;;  %v72_v12 = vld [vmem:[%s1560_s0 + $0x168] sm:$0xff] }
   0x5   :  { %1096 = vmatpush3.xpose.msk.msra.mxu1 %vm119_vm0, %v74_v3  ;;  %1057 = vmatprep.subr.msk.mxu0 %vm119_vm0, %v57_v4  ;;  %v55_v13 = vld [vmem:[%s1560_s0 + $0xe0] sm:$0xff]  ;;  %v54_v17 = vld [vmem:[%s1560_s0 + $0xd8] sm:$0xff]  ;;  %v53_v21 = vld [vmem:[%s1560_s0 + $0xd0] sm:$0xff] }
   0x6   :  { %1097 = vmatprep.subr.msk.mxu1 %vm119_vm0, %v89_v5  ;;  %v87_v14 = vld [vmem:[%s1560_s0 + $0x1e0] sm:$0xff]  ;;  %v86_v18 = vld [vmem:[%s1560_s0 + $0x1d8] sm:$0xff]  ;;  %v85_v22 = vld [vmem:[%s1560_s0 + $0x1d0] sm:$0xff] }
   0x7   :  { %v39_v15 = vld [vmem:[%s1560_s0 + $0x60] sm:$0xff]  ;;  %v38_v19 = vld [vmem:[%s1560_s0 + $0x58] sm:$0xff]  ;;  %v37_v23 = vld [vmem:[%s1560_s0 + $0x50] sm:$0xff] }
   0x8   :  { %1058 = vmatpush3.xpose.msk.msra.mxu0 %vm119_vm0, %v41_v6  ;;  %v71_v16 = vld [vmem:[%s1560_s0 + $0x160] sm:$0xff]  ;;  %v70_v20 = vld [vmem:[%s1560_s0 + $0x158] sm:$0xff]  ;;  %v69_v24 = vld [vmem:[%s1560_s0 + $0x150] sm:$0xff] }
   0x9   :  { %1098 = vmatpush3.xpose.msk.msra.mxu1 %vm119_vm0, %v73_v7  ;;  %1059 = vmatprep.subr.msk.mxu0 %vm119_vm0, %v56_v8  ;;  %v52_v25 = vld [vmem:[%s1560_s0 + $0xc8] sm:$0xff]  ;;  %v1308_v27 = vld [vmem:[%s1561_s1] sm:$0xff]  ;;  %v98_v28 = vld [vmem:[%s1562_s2 + $0x18] sm:$0xff] }
   0xa   :  { %1099 = vmatprep.subr.msk.mxu1 %vm119_vm0, %v88_v9  ;;  %v84_v26 = vld [vmem:[%s1560_s0 + $0x1c8] sm:$0xff]  ;;  %v51_v32 = vld [vmem:[%s1560_s0 + $0xc0] sm:$0xff]  ;;  %1087 = vmatprep.mubr.msk.f32.mxu0 %vm119_vm0, %v1308_v27 }
   0xb   :  { %v36_v29 = vld [vmem:[%s1560_s0 + $0x48] sm:$0xff]  ;;  %v83_v33 = vld [vmem:[%s1560_s0 + $0x1c0] sm:$0xff]  ;;  %1127 = vmatprep.mubr.msk.f32.mxu1 %vm119_vm0, %v1308_v27  ;;  %116 = vperm.xlu0 %1138, %v98_v28  }
   0xc   :  { %1060 = vmatpush3.xpose.msk.msra.mxu0 %vm119_vm0, %v40_v11  ;;  %v68_v30 = vld [vmem:[%s1560_s0 + $0x148] sm:$0xff] }
   0xd   :  { %1100 = vmatpush3.xpose.msk.msra.mxu1 %vm119_vm0, %v72_v12  ;;  %1061 = vmatprep.subr.msk.mxu0 %vm119_vm0, %v55_v13  ;;  %v96_v31 = vld [vmem:[%s1562_s2 + $0x8] sm:$0xff] }
   0xe   :  { %1101 = vmatprep.subr.msk.mxu1 %vm119_vm0, %v87_v14  ;;  %106 = vperm.xlu1 %1139, %v96_v31  }
  0x10   :  { %1062 = vmatpush3.xpose.msk.msra.mxu0 %vm119_vm0, %v39_v15 }
  0x11   :  { %1102 = vmatpush3.xpose.msk.msra.mxu1 %vm119_vm0, %v71_v16  ;;  %1063 = vmatprep.subr.msk.mxu0 %vm119_vm0, %v54_v17 }
  0x12   :  { %1103 = vmatprep.subr.msk.mxu1 %vm119_vm0, %v86_v18 }
  0x14   :  { %1064 = vmatpush3.xpose.msk.msra.mxu0 %vm119_vm0, %v38_v19 }
  0x15   :  { %1104 = vmatpush3.xpose.msk.msra.mxu1 %vm119_vm0, %v70_v20  ;;  %1065 = vmatprep.subr.msk.mxu0 %vm119_vm0, %v53_v21 }
  0x16   :  { %1105 = vmatprep.subr.msk.mxu1 %vm119_vm0, %v85_v22 }
  0x18   :  { %1066 = vmatpush3.xpose.msk.msra.mxu0 %vm119_vm0, %v37_v23 }
  0x19   :  { %1106 = vmatpush3.xpose.msk.msra.mxu1 %vm119_vm0, %v69_v24  ;;  %1067 = vmatprep.subr.msk.mxu0 %vm119_vm0, %v52_v25 }
  0x1a   :  { %1107 = vmatprep.subr.msk.mxu1 %vm119_vm0, %v84_v26 }
  0x1b   :  { %12 = vsyncpa [#allocation3], 0  ;;  %v97_v34 = vld [vmem:[%s1562_s2 + $0x10] sm:$0xff]  ;;  %v95_v35 = vld [vmem:[%s1562_s2] sm:$0xff]  ;;  %v1163_v14 = vmov 0.0   ;;  %vm562_vm1 = vcmask 261120  }
  0x1c   :  { %1068 = vmatpush3.xpose.msk.msra.mxu0 %vm119_vm0, %v36_v29  ;;  %v35_v36 = vld [vmem:[%s1560_s0 + $0x40] sm:$0xff]  ;;  %v50_v38 = vld [vmem:[%s1560_s0 + $0xb8] sm:$0xff]  ;;  %111 = vperm.xlu0 %1138, %v97_v34   ;;  %v540_v41 = vld [vmem:[%s1564_s4 + $0x10] sm:$0xff]  ;;  %s1164_s15 = smov [#allocation2]  }
  0x1d   :  { %1108 = vmatpush3.xpose.msk.msra.mxu1 %vm119_vm0, %v68_v30  ;;  %1069 = vmatprep.subr.msk.mxu0 %vm119_vm0, %v51_v32  ;;  %v67_v37 = vld [vmem:[%s1560_s0 + $0x140] sm:$0xff]  ;;  %v82_v39 = vld [vmem:[%s1560_s0 + $0x1b8] sm:$0xff]  ;;  %v49_v44 = vld [vmem:[%s1560_s0 + $0xb0] sm:$0xff]  ;;  %s961_s16 = sshll.u32 %s1164_s15, 4  ;;  %s962_s16 = int_to_ptr.vmem [resolvable:$true] %s961_s16 }
  0x1e   :  { %1109 = vmatprep.subr.msk.mxu1 %vm119_vm0, %v83_v33  ;;  %101 = vperm.xlu1 %1139, %v95_v35   ;;  %v541_v40 = vld [vmem:[%s1564_s4 + $0x18] sm:$0xff]  ;;  %v81_v45 = vld [vmem:[%s1560_s0 + $0x1b0] sm:$0xff]  ;;  %v539_v46 = vld [vmem:[%s1564_s4 + $0x8] sm:$0xff]  ;;  %p1145_p1 = scmp.lt.s32.totalorder %s962_s16, %s962_s16 }
  0x1f   :  { %v34_v42 = vld [vmem:[%s1560_s0 + $0x38] sm:$0xff]  ;;  %v538_v47 = vld [vmem:[%s1564_s4] sm:$0xff]  ;;  %v33_v48 = vld [vmem:[%s1560_s0 + $0x30] sm:$0xff] }
  0x20   :  { %1070 = vmatpush3.xpose.msk.msra.mxu0 %vm119_vm0, %v35_v36  ;;  %v66_v43 = vld [vmem:[%s1560_s0 + $0x138] sm:$0xff]  ;;  %559 = vperm.xlu0 %1138, %v541_v40   ;;  %v65_v49 = vld [vmem:[%s1560_s0 + $0x130] sm:$0xff]  ;;  %v48_v50 = vld [vmem:[%s1560_s0 + $0xa8] sm:$0xff] }
  0x21   :  { %1110 = vmatpush3.xpose.msk.msra.mxu1 %vm119_vm0, %v67_v37  ;;  %1071 = vmatprep.subr.msk.mxu0 %vm119_vm0, %v50_v38  ;;  %v80_v51 = vld [vmem:[%s1560_s0 + $0x1a8] sm:$0xff]  ;;  %v786_v52 = vld [vmem:[%s1566_s6] sm:$0xf]  ;;  %v46_v59 = vld [vmem:[%s1560_s0 + $0x98] sm:$0xff] }
  0x22   :  { %1111 = vmatprep.subr.msk.mxu1 %vm119_vm0, %v82_v39  ;;  %554 = vperm.xlu1 %1139, %v540_v41   ;;  %v32_v53 = vld [vmem:[%s1560_s0 + $0x28] sm:$0xff]  ;;  %v47_v55 = vld [vmem:[%s1560_s0 + $0xa0] sm:$0xff]  ;;  %v78_v60 = vld [vmem:[%s1560_s0 + $0x198] sm:$0xff] }
  0x23   :  { %v64_v54 = vld [vmem:[%s1560_s0 + $0x128] sm:$0xff]  ;;  %v79_v56 = vld [vmem:[%s1560_s0 + $0x1a0] sm:$0xff]  ;;  %v30_v61 = vld [vmem:[%s1560_s0 + $0x18] sm:$0xff] }
  0x24   :  { %1072 = vmatpush3.xpose.msk.msra.mxu0 %vm119_vm0, %v34_v42  ;;  %549 = vperm.xlu0 %1138, %v539_v46   ;;  %v31_v57 = vld [vmem:[%s1560_s0 + $0x20] sm:$0xff]  ;;  %v62_v62 = vld [vmem:[%s1560_s0 + $0x118] sm:$0xff]  ;;  %v45_v63 = vld [vmem:[%s1560_s0 + $0x90] sm:$0xff] }
  0x25   :  { %1112 = vmatpush3.xpose.msk.msra.mxu1 %vm119_vm0, %v66_v43  ;;  %1073 = vmatprep.subr.msk.mxu0 %vm119_vm0, %v49_v44  ;;  %v63_v58 = vld [vmem:[%s1560_s0 + $0x120] sm:$0xff]  ;;  %v77_v0 = vld [vmem:[%s1560_s0 + $0x190] sm:$0xff]  ;;  %v44_v3 = vld [vmem:[%s1560_s0 + $0x88] sm:$0xff] }
  0x26   :  { %1113 = vmatprep.subr.msk.mxu1 %vm119_vm0, %v81_v45  ;;  %544 = vperm.xlu1 %1139, %v538_v47   ;;  %v29_v1 = vld [vmem:[%s1560_s0 + $0x10] sm:$0xff]  ;;  %v76_v4 = vld [vmem:[%s1560_s0 + $0x188] sm:$0xff]  ;;  %v43_v7 = vld [vmem:[%s1560_s0 + $0x80] sm:$0xff] }
  0x27   :  { %v61_v2 = vld [vmem:[%s1560_s0 + $0x110] sm:$0xff]  ;;  %v28_v5 = vld [vmem:[%s1560_s0 + $0x8] sm:$0xff]  ;;  %v75_v8 = vld [vmem:[%s1560_s0 + $0x180] sm:$0xff] }
  0x28   :  { %1074 = vmatpush3.xpose.msk.msra.mxu0 %vm119_vm0, %v33_v48  ;;  %789 = vperm.xlu0 %1138, %v786_v52   ;;  %v60_v6 = vld [vmem:[%s1560_s0 + $0x108] sm:$0xff]  ;;  %v27_v9 = vld [vmem:[%s1560_s0] sm:$0xff]  ;;  %v93_v12 = vld [vmem:[%s1561_s1 + $0x10] sm:$0xff] }
  0x29   :  { %1114 = vmatpush3.xpose.msk.msra.mxu1 %vm119_vm0, %v65_v49  ;;  %1075 = vmatprep.subr.msk.mxu0 %vm119_vm0, %v48_v50  ;;  %v59_v10 = vld [vmem:[%s1560_s0 + $0x100] sm:$0xff]  ;;  %v92_v11 = vld [vmem:[%s1561_s1 + $0x8] sm:$0xff]  ;;  %v94_v13 = vld [vmem:[%s1561_s1 + $0x18] sm:$0xff] }
  0x2a   :  { %1115 = vmatprep.subr.msk.mxu1 %vm119_vm0, %v80_v51 }
  0x2c   :  { %1076 = vmatpush3.xpose.msk.msra.mxu0 %vm119_vm0, %v32_v53 }
  0x2d   :  { %1116 = vmatpush3.xpose.msk.msra.mxu1 %vm119_vm0, %v64_v54  ;;  %1077 = vmatprep.subr.msk.mxu0 %vm119_vm0, %v47_v55 }
  0x2e   :  { %1117 = vmatprep.subr.msk.mxu1 %vm119_vm0, %v79_v56 }
  0x30   :  { %1078 = vmatpush3.xpose.msk.msra.mxu0 %vm119_vm0, %v31_v57 }
  0x31   :  { %1118 = vmatpush3.xpose.msk.msra.mxu1 %vm119_vm0, %v63_v58  ;;  %1079 = vmatprep.subr.msk.mxu0 %vm119_vm0, %v46_v59 }
  0x32   :  { %1119 = vmatprep.subr.msk.mxu1 %vm119_vm0, %v78_v60 }
  0x34   :  { %1080 = vmatpush3.xpose.msk.msra.mxu0 %vm119_vm0, %v30_v61 }
  0x35   :  { %1120 = vmatpush3.xpose.msk.msra.mxu1 %vm119_vm0, %v62_v62  ;;  %1081 = vmatprep.subr.msk.mxu0 %vm119_vm0, %v45_v63 }
  0x36   :  { %1121 = vmatprep.subr.msk.mxu1 %vm119_vm0, %v77_v0 }
  0x38   :  { %1082 = vmatpush3.xpose.msk.msra.mxu0 %vm119_vm0, %v29_v1 }
  0x39   :  { %1122 = vmatpush3.xpose.msk.msra.mxu1 %vm119_vm0, %v61_v2  ;;  %1083 = vmatprep.subr.msk.mxu0 %vm119_vm0, %v44_v3 }
  0x3a   :  { %1123 = vmatprep.subr.msk.mxu1 %vm119_vm0, %v76_v4 }
  0x3c   :  { %1084 = vmatpush3.xpose.msk.msra.mxu0 %vm119_vm0, %v28_v5 }
  0x3d   :  { %1124 = vmatpush3.xpose.msk.msra.mxu1 %vm119_vm0, %v60_v6  ;;  %1085 = vmatprep.subr.msk.mxu0 %vm119_vm0, %v43_v7 }
  0x3e   :  { %1125 = vmatprep.subr.msk.mxu1 %vm119_vm0, %v75_v8 }
  0x40   :  { %1086 = vmatpush3.xpose.msk.msra.mxu0 %vm119_vm0, %v27_v9 }
  0x41   :  { %1126 = vmatpush3.xpose.msk.msra.mxu1 %vm119_vm0, %v59_v10 }
  0x43   :  { %1088 = vmatmul.mubr.msk.f32.vlgmr.msra.gmra.mxu0 %vm119_vm0, %v1308_v27 }
  0x44   :  { %1128 = vmatmul.mubr.msk.f32.vlgmr.msra.gmra.mxu1 %vm119_vm0, %v1308_v27  ;;  %1089 = vmatprep.mubr.msk.f32.mxu0 %vm119_vm0, %v92_v11 }
  0x45   :  { %1129 = vmatprep.mubr.msk.f32.mxu1 %vm119_vm0, %v92_v11 }
  0x47   :  { %1090 = vmatmul.mubr.msk.f32.gmra.mxu0 %vm119_vm0, %v92_v11 }
  0x48   :  { %1130 = vmatmul.mubr.msk.f32.gmra.mxu1 %vm119_vm0, %v92_v11  ;;  %1091 = vmatprep.mubr.msk.f32.mxu0 %vm119_vm0, %v93_v12 }
  0x49   :  { %1131 = vmatprep.mubr.msk.f32.mxu1 %vm119_vm0, %v93_v12 }
  0x4b   :  { %1092 = vmatmul.mubr.msk.f32.gmra.mxu0 %vm119_vm0, %v93_v12 }
  0x4c   :  { %1132 = vmatmul.mubr.msk.f32.gmra.mxu1 %vm119_vm0, %v93_v12  ;;  %1093 = vmatprep.mubr.msk.f32.mxu0 %vm119_vm0, %v94_v13 }
  0x4d   :  { %1133 = vmatprep.mubr.msk.f32.mxu1 %vm119_vm0, %v94_v13 }
  0x4f   :  { %1094 = vmatmul.mubr.msk.f32.gmra.mxu0 %vm119_vm0, %v94_v13 }
  0x50   :  { %1134 = vmatmul.mubr.msk.f32.gmra.mxu1 %vm119_vm0, %v94_v13  ;;  %639 = vmatprep.mubr.f32.mxu0 %v1163_v14 }
  0x51   :  { %728 = vmatprep.mubr.f32.mxu1 %v1163_v14 }
  0x86   :  { %v117_v21 = vpop.permute.xlu0 %116 }
  0x89   :  { %v107_v24 = vpop.permute.xlu1 %106 }
  0x97   :  { %v112_v29 = vpop.permute.xlu0 %111 }
  0x99   :  { %v102_v33 = vpop.permute.xlu1 %101 }
 0x103   :  { %v390_v15 = vpop.f32.mrf.mxu0 }
 0x104   :  { %v479_v16 = vpop.f32.mrf.mxu1  ;;  %v391_v55 = vadd.f32 %v390_v15, %v102_v33 }
 0x105   :  { %v392_v17 = vpop.f32.mrf.mxu0  ;;  %v480_v56 = vadd.f32 %v479_v16, %v102_v33 }
 0x106   :  { %v481_v18 = vpop.f32.mrf.mxu1  ;;  %v393_v37 = vadd.f32 %v392_v17, %v102_v33  ;;  %v502_v7 = vmul.f32 0.01, %v391_v55 }
 0x107   :  { %v396_v19 = vpop.f32.mrf.mxu0  ;;  %v482_v51 = vadd.f32 %v481_v18, %v102_v33  ;;  %v504_v8 = vmul.f32 0.01, %v480_v56  ;;  %v555_v33 = vpop.permute.xlu1 %554 }
 0x108   :  { %v485_v20 = vpop.f32.mrf.mxu1  ;;  %v397_v38 = vadd.f32 %v396_v19, %v107_v24  ;;  %v503_v3 = vmul.f32 0.01, %v393_v37  ;;  %v518_v18 = vmax.f32 %v391_v55, %v502_v7 }
 0x109   :  { %v398_v22 = vpop.f32.mrf.mxu0  ;;  %v486_v47 = vadd.f32 %v485_v20, %v107_v24  ;;  %v505_v4 = vmul.f32 0.01, %v482_v51  ;;  %v520_v19 = vmax.f32 %v480_v56, %v504_v8  ;;  %v534_v20 = vld [vmem:[%s1563_s3] sm:$0xff] }
 0x10a   :  { %v487_v23 = vpop.f32.mrf.mxu1  ;;  %v399_v43 = vadd.f32 %v398_v22, %v107_v24  ;;  %v506_v63 = vmul.f32 0.01, %v397_v38  ;;  %v519_v16 = vmax.f32 %v393_v37, %v503_v3  ;;  %v536_v22 = vld [vmem:[%s1563_s3 + $0x10] sm:$0xff] }
 0x10b   :  { %v402_v25 = vpop.f32.mrf.mxu0  ;;  %v488_v44 = vadd.f32 %v487_v23, %v107_v24  ;;  %v508_v0 = vmul.f32 0.01, %v486_v47  ;;  %v521_v17 = vmax.f32 %v482_v51, %v505_v4  ;;  %v537_v23 = vld [vmem:[%s1563_s3 + $0x18] sm:$0xff] }
 0x10c   :  { %v491_v26 = vpop.f32.mrf.mxu1  ;;  %v403_v39 = vadd.f32 %v402_v25, %v112_v29  ;;  %v507_v59 = vmul.f32 0.01, %v399_v43  ;;  %v522_v13 = vmax.f32 %v397_v38, %v506_v63 }
 0x10d   :  { %v404_v27 = vpop.f32.mrf.mxu0  ;;  %v492_v40 = vadd.f32 %v491_v26, %v112_v29  ;;  %v509_v60 = vmul.f32 0.01, %v488_v44  ;;  %v524_v15 = vmax.f32 %v486_v47, %v508_v0 }
 0x10e   :  { %v493_v28 = vpop.f32.mrf.mxu1  ;;  %v405_v30 = vadd.f32 %v404_v27, %v112_v29  ;;  %v510_v57 = vmul.f32 0.01, %v403_v39  ;;  %v523_v11 = vmax.f32 %v399_v43, %v507_v59 }
 0x10f   :  { %v408_v31 = vpop.f32.mrf.mxu0  ;;  %v494_v34 = vadd.f32 %v493_v28, %v112_v29  ;;  %v512_v58 = vmul.f32 0.01, %v492_v40  ;;  %v525_v12 = vmax.f32 %v488_v44, %v509_v60 }
 0x110   :  { %v497_v32 = vpop.f32.mrf.mxu1  ;;  %v409_v35 = vadd.f32 %v408_v31, %v117_v21  ;;  %v511_v48 = vmul.f32 0.01, %v405_v30  ;;  %v526_v9 = vmax.f32 %v403_v39, %v510_v57 }
 0x111   :  { %v498_v36 = vadd.f32 %v497_v32, %v117_v21  ;;  %v410_v41 = vpop.f32.mrf.mxu0  ;;  %v513_v52 = vmul.f32 0.01, %v494_v34  ;;  %v528_v10 = vmax.f32 %v492_v40, %v512_v58  ;;  %v560_v32 = vpop.permute.xlu0 %559 }
 0x112   :  { %v499_v42 = vpop.f32.mrf.mxu1  ;;  %v411_v45 = vadd.f32 %v410_v41, %v117_v21  ;;  %v514_v49 = vmul.f32 0.01, %v409_v35  ;;  %v527_v5 = vmax.f32 %v405_v30, %v511_v48 }
 0x113   :  { %v500_v46 = vadd.f32 %v499_v42, %v117_v21  ;;  %v516_v50 = vmul.f32 0.01, %v498_v36  ;;  %v529_v6 = vmax.f32 %v494_v34, %v513_v52  ;;  %v535_v21 = vld [vmem:[%s1563_s3 + $0x8] sm:$0xff]  ;;  %v545_v42 = vpop.permute.xlu1 %544 }
 0x114   :  { %v515_v53 = vmul.f32 0.01, %v411_v45  ;;  %v530_v1 = vmax.f32 %v409_v35, %v514_v49 }
 0x115   :  { %v517_v54 = vmul.f32 0.01, %v500_v46  ;;  %v532_v2 = vmax.f32 %v498_v36, %v516_v50  ;;  %v550_v41 = vpop.permute.xlu0 %549 }
 0x116   :  { %v531_v61 = vmax.f32 %v411_v45, %v515_v53 }
 0x117   :  { %v533_v62 = vmax.f32 %v500_v46, %v517_v54 }
 0x118   :  { %599 = vmatprep.subr.mxu0 %v531_v61 }
 0x119   :  { %688 = vmatprep.subr.mxu1 %v533_v62  ;;  %600 = vmatpush1.msra.mxu0 %v530_v1 }
 0x11a   :  { %689 = vmatpush1.msra.mxu1 %v532_v2  ;;  %601 = vmatprep.subr.mxu0 %v527_v5 }
 0x11b   :  { %690 = vmatprep.subr.mxu1 %v529_v6  ;;  %602 = vmatpush1.msra.mxu0 %v526_v9 }
 0x11c   :  { %691 = vmatpush1.msra.mxu1 %v528_v10  ;;  %603 = vmatprep.subr.mxu0 %v523_v11 }
 0x11d   :  { %692 = vmatprep.subr.mxu1 %v525_v12  ;;  %604 = vmatpush1.msra.mxu0 %v522_v13 }
 0x11e   :  { %693 = vmatpush1.msra.mxu1 %v524_v15  ;;  %605 = vmatprep.subr.mxu0 %v519_v16 }
 0x11f   :  { %694 = vmatprep.subr.mxu1 %v521_v17  ;;  %606 = vmatpush1.msra.mxu0 %v518_v18 }
 0x120   :  { %695 = vmatpush1.msra.mxu1 %v520_v19  ;;  %1041 = vmatmul.mubr.msk.f32.vlgmr.msra.gmra.mxu0 %vm562_vm1, %v534_v20 }
 0x121   :  { %1045 = vmatmul.mubr.msk.f32.vlgmr.msra.gmra.mxu1 %vm562_vm1, %v534_v20  ;;  %645 = vmatprep.mubr.f32.mxu0 %v1163_v14 }
 0x122   :  { %734 = vmatprep.mubr.f32.mxu1 %v1163_v14 }
 0x124   :  { %1042 = vmatmul.mubr.msk.f32.gmra.mxu0 %vm562_vm1, %v535_v21 }
 0x125   :  { %1046 = vmatmul.mubr.msk.f32.gmra.mxu1 %vm562_vm1, %v535_v21  ;;  %651 = vmatprep.mubr.f32.mxu0 %v1163_v14 }
 0x126   :  { %740 = vmatprep.mubr.f32.mxu1 %v1163_v14 }
 0x128   :  { %1043 = vmatmul.mubr.msk.f32.gmra.mxu0 %vm562_vm1, %v536_v22 }
 0x129   :  { %1047 = vmatmul.mubr.msk.f32.gmra.mxu1 %vm562_vm1, %v536_v22  ;;  %657 = vmatprep.mubr.f32.mxu0 %v1163_v14 }
 0x12a   :  { %746 = vmatprep.mubr.f32.mxu1 %v1163_v14 }
 0x12c   :  { %1044 = vmatmul.mubr.msk.f32.gmra.mxu0 %vm562_vm1, %v537_v23 }
 0x12d   :  { %1048 = vmatmul.mubr.msk.f32.gmra.mxu1 %vm562_vm1, %v537_v23  ;;  %859 = vmatprep.mubr.f32.mxu0 %v1163_v14 }
 0x12e   :  { %930 = vmatprep.mubr.f32.mxu1 %v1163_v14 }
 0x1e0   :  { %v641_v24 = vpop.f32.mrf.mxu0 }
 0x1e1   :  { %v730_v25 = vpop.f32.mrf.mxu1  ;;  %v642_v63 = vadd.f32 %v641_v24, %v545_v42 }
 0x1e2   :  { %v643_v26 = vpop.f32.mrf.mxu0  ;;  %v731_v0 = vadd.f32 %v730_v25, %v545_v42 }
 0x1e3   :  { %v732_v27 = vpop.f32.mrf.mxu1  ;;  %v644_v45 = vadd.f32 %v643_v26, %v545_v42  ;;  %v753_v16 = vmul.f32 0.01, %v642_v63 }
 0x1e4   :  { %v647_v28 = vpop.f32.mrf.mxu0  ;;  %v733_v59 = vadd.f32 %v732_v27, %v545_v42  ;;  %v755_v17 = vmul.f32 0.01, %v731_v0 }
 0x1e5   :  { %v736_v29 = vpop.f32.mrf.mxu1  ;;  %v648_v46 = vadd.f32 %v647_v28, %v550_v41  ;;  %v754_v11 = vmul.f32 0.01, %v644_v45  ;;  %v769_v26 = vmax.f32 %v642_v63, %v753_v16  ;;  %v785_v28 = vld [vmem:[%s1565_s5] sm:$0xf]  ;;  %s1140_s5 = scalar_lea.vmem %s962_s16, 256 }
 0x1e6   :  { %v649_v30 = vpop.f32.mrf.mxu0  ;;  %v737_v55 = vadd.f32 %v736_v29, %v550_v41  ;;  %v756_v12 = vmul.f32 0.01, %v733_v59  ;;  %v771_v27 = vmax.f32 %v731_v0, %v755_v17  ;;  %v790_v29 = vpop.permute.xlu0 %789  ;;  %p1141_p0 = scmp.ne.s32.totalorder %s962_s16, %s1140_s5  ;;  %p1146_p2 = scmp.lt.s32.totalorder %s1140_s5, %s1140_s5 }
 0x1e7   :  { %v738_v31 = vpop.f32.mrf.mxu1  ;;  %v650_v51 = vadd.f32 %v649_v30, %v550_v41  ;;  %v757_v7 = vmul.f32 0.01, %v648_v46  ;;  %v770_v24 = vmax.f32 %v644_v45, %v754_v11 }
 0x1e8   :  { %v653_v34 = vpop.f32.mrf.mxu0  ;;  %v739_v52 = vadd.f32 %v738_v31, %v550_v41  ;;  %v759_v8 = vmul.f32 0.01, %v737_v55  ;;  %v772_v25 = vmax.f32 %v733_v59, %v756_v12  ;;  %p1147_p3 = por %p1146_p2, %p1145_p1 }
 0x1e9   :  { %v742_v35 = vpop.f32.mrf.mxu1  ;;  %v654_v47 = vadd.f32 %v653_v34, %v555_v33  ;;  %v758_v3 = vmul.f32 0.01, %v650_v51  ;;  %v773_v22 = vmax.f32 %v648_v46, %v757_v7 }
 0x1ea   :  { %v655_v36 = vpop.f32.mrf.mxu0  ;;  %v743_v48 = vadd.f32 %v742_v35, %v555_v33  ;;  %v760_v4 = vmul.f32 0.01, %v739_v52  ;;  %v775_v23 = vmax.f32 %v737_v55, %v759_v8  ;;  %p1148_p4 = pnand %p1147_p3, %p1141_p0 }
 0x1eb   :  { %v744_v37 = vpop.f32.mrf.mxu1  ;;  %v656_v38 = vadd.f32 %v655_v36, %v555_v33  ;;  %v761_v1 = vmul.f32 0.01, %v654_v47  ;;  %v774_v20 = vmax.f32 %v650_v51, %v758_v3 }
 0x1ec   :  { %v659_v39 = vpop.f32.mrf.mxu0  ;;  %v745_v14 = vadd.f32 %v744_v37, %v555_v33  ;;  %v763_v2 = vmul.f32 0.01, %v743_v48  ;;  %v776_v21 = vmax.f32 %v739_v52, %v760_v4 }
 0x1ed   :  { %v748_v40 = vpop.f32.mrf.mxu1  ;;  %v660_v43 = vadd.f32 %v659_v39, %v560_v32  ;;  %v762_v56 = vmul.f32 0.01, %v656_v38  ;;  %v777_v18 = vmax.f32 %v654_v47, %v761_v1 }
 0x1ee   :  { %v749_v44 = vadd.f32 %v748_v40, %v560_v32  ;;  %v661_v49 = vpop.f32.mrf.mxu0  ;;  %v764_v60 = vmul.f32 0.01, %v745_v14  ;;  %v779_v19 = vmax.f32 %v743_v48, %v763_v2 }
 0x1ef   :  { %v750_v50 = vpop.f32.mrf.mxu1  ;;  %v662_v53 = vadd.f32 %v661_v49, %v560_v32  ;;  %v765_v57 = vmul.f32 0.01, %v660_v43  ;;  %v778_v13 = vmax.f32 %v656_v38, %v762_v56 }
 0x1f0   :  { %v751_v54 = vadd.f32 %v750_v50, %v560_v32  ;;  %v767_v58 = vmul.f32 0.01, %v749_v44  ;;  %v780_v15 = vmax.f32 %v745_v14, %v764_v60 }
 0x1f1   :  { %v766_v61 = vmul.f32 0.01, %v662_v53  ;;  %v781_v9 = vmax.f32 %v660_v43, %v765_v57 }
 0x1f2   :  { %v768_v62 = vmul.f32 0.01, %v751_v54  ;;  %v783_v10 = vmax.f32 %v749_v44, %v767_v58 }
 0x1f3   :  { %v782_v5 = vmax.f32 %v662_v53, %v766_v61 }
 0x1f4   :  { %v784_v6 = vmax.f32 %v751_v54, %v768_v62 }
 0x1f5   :  { %819 = vmatprep.subr.mxu0 %v782_v5 }
 0x1f6   :  { %890 = vmatprep.subr.mxu1 %v784_v6  ;;  %820 = vmatpush1.msra.mxu0 %v781_v9 }
 0x1f7   :  { %891 = vmatpush1.msra.mxu1 %v783_v10  ;;  %821 = vmatprep.subr.mxu0 %v778_v13 }
 0x1f8   :  { %892 = vmatprep.subr.mxu1 %v780_v15  ;;  %822 = vmatpush1.msra.mxu0 %v777_v18 }
 0x1f9   :  { %893 = vmatpush1.msra.mxu1 %v779_v19  ;;  %823 = vmatprep.subr.mxu0 %v774_v20 }
 0x1fa   :  { %894 = vmatprep.subr.mxu1 %v776_v21  ;;  %824 = vmatpush1.msra.mxu0 %v773_v22 }
 0x1fb   :  { %895 = vmatpush1.msra.mxu1 %v775_v23  ;;  %825 = vmatprep.subr.mxu0 %v770_v24 }
 0x1fc   :  { %896 = vmatprep.subr.mxu1 %v772_v25  ;;  %826 = vmatpush1.msra.mxu0 %v769_v26 }
 0x1fd   :  { %897 = vmatpush1.msra.mxu1 %v771_v27  ;;  %1049 = vmatmul.mubr.msk.f32.vlgmr.msra.gmra.mxu0 %vm562_vm1, %v785_v28 }
 0x1fe   :  { %1050 = vmatmul.mubr.msk.f32.vlgmr.msra.gmra.mxu1 %vm562_vm1, %v785_v28 }
 0x2bd   :  { %v861_v30 = vpop.f32.mrf.mxu0 }
 0x2be   :  { %v932_v31 = vpop.f32.mrf.mxu1  ;;  %v862_v32 = vadd.f32 %v861_v30, %v790_v29 }
 0x2bf   :  { %v933_v33 = vadd.f32 %v932_v31, %v790_v29  ;;  %v863_v34 = vpop.f32.mrf.mxu0 }
 0x2c0   :  { %v934_v35 = vpop.f32.mrf.mxu1  ;;  %v864_v36 = vadd.f32 %v863_v34, %v790_v29  ;;  %v1051_v38 = vclamps-f32 %v862_v32, 1.0 }
 0x2c1   :  { %v935_v37 = vadd.f32 %v934_v35, %v790_v29  ;;  %v1053_v39 = vclamps-f32 %v933_v33, 1.0 }
 0x2c2   :  { %v1052_v40 = vclamps-f32 %v864_v36, 1.0 }
 0x2c3   :  { %v1054_v41 = vclamps-f32 %v935_v37, 1.0 }
 0x2c4   :  { %v949_v42 = vcombine.low %v1051_v38, %v1052_v40 }
 0x2c5   :  { %v950_v14 = vcombine.low %v1053_v39, %v1054_v41 }
 0x2c6   :  { %953 = vst [vmem:[#allocation2] sm:$0xff] %v949_v42 }
 0x2c7   :  { %954 = vst [vmem:[#allocation2 + $0x8] sm:$0xff] %v950_v14 }
 0x2c8   :  { %1151 = shalt.err (!%p1148_p4)
}
 0x2c9   :  { %964 = dma.vmem_to_hbm [thread:$0]  %s962_s16, 256, %s1567_s7, [#allocation3]  }
 0x2ca   :  { %1160 = dma.done.wait [#allocation3], 256  }
 0x2cb   :  { %1161 = vsyncadd [#allocation3], 4294967040 }
 0x2cc   :  { %968 = vsyncpa [#allocation3], 1 }

</bundles_post_ra>
